<compile_context>
chip_gen: v5e
topology: v5e:2x2
jax: 0.10.0
libtpu: 0.0.40
codegen_flags: <defaults>
</compile_context>

<pallas_src>
import functools

import jax
import jax.numpy as jnp
from jax.experimental import pallas as pl
from jax.experimental.pallas import tpu as pltpu

_LANE = 128
_SUBLANE = 8
_NUM_CORES = 2  # node-range split for v7x dual-TC; harmless (serial) on v5e/v6e


def _round_up(x, m):
    return ((x + m - 1) // m) * m


def _phi_scatter_kernel(n_nodes, tn, tiles_per_core, b_pad,
                        batch_ref, x_ref,
                        w1_ref, b1_ref, w2_ref, b2_ref,
                        agg_ref):
    c = pl.program_id(0)  # core / node-range half
    k = pl.program_id(1)  # node tile within this core's range

    # Zero this core's partial aggregate at the start of its node range.
    @pl.when(k == 0)
    def _():
        agg_ref[...] = jnp.zeros_like(agg_ref)

    # Nominal global node offset of this tile.  The last (c, k) step may be an
    # overflow tile (its block index is clamped in the index_map); every node in
    # it has base + i >= n_nodes and is masked below, so it contributes nothing.
    base = (c * tiles_per_core + k) * tn

    # ---- phi MLP on this node tile (bf16 MXU operands, f32 accumulation) ----
    row_valid = (base + jax.lax.broadcasted_iota(jnp.int32, (tn, 1), 0)) < n_nodes
    x = jnp.where(row_valid, x_ref[...], 0.0).astype(jnp.bfloat16)        # [tn, f_x]
    h1 = jnp.dot(x, w1_ref[...], preferred_element_type=jnp.float32) + b1_ref[...]
    h1 = jnp.maximum(h1, 0.0)                                             # [tn, mlp_h] f32
    phi = jnp.dot(h1.astype(jnp.bfloat16), w2_ref[...],
                  preferred_element_type=jnp.float32) + b2_ref[...]       # [tn, h] f32

    # ---- scatter_sum over batch ids as a small bf16 one-hot matmul ----------
    lane_valid = (base + jax.lax.broadcasted_iota(jnp.int32, (1, tn), 1)) < n_nodes
    batch = jnp.where(lane_valid, batch_ref[...], b_pad)   # pad id matches no row
    graph_ids = jax.lax.broadcasted_iota(jnp.int32, (b_pad, tn), 0)
    onehot = (graph_ids == batch).astype(jnp.bfloat16)                    # [b_pad, tn]
    agg_ref[...] += jnp.dot(onehot, phi.astype(jnp.bfloat16),
                            preferred_element_type=jnp.float32)           # [b_pad, h]


def deepset_forward(x, batch, params, n_graphs, *, node_tile=4096):
    """DeepSet forward.  x: [N, f_x], batch: [N] int32 graph ids, params: f32."""
    n_nodes, f_x = x.shape
    h = params["w2"].shape[1]

    # Graph axis padded to a sublane multiple; node tile forced to a lane multiple.
    b_pad = max(_SUBLANE, _round_up(n_graphs, _SUBLANE))
    tn = max(_LANE, _round_up(min(node_tile, n_nodes), _LANE))
    tiles_total = -(-n_nodes // tn)
    tiles_per_core = -(-tiles_total // _NUM_CORES)

    # No host-side pad/cast of x: it streams untouched and is cast/masked in-kernel.
    batch2d = batch.astype(jnp.int32).reshape(1, n_nodes)

    def stream_idx(c, k):
        # Clamp the (at most one) overflow tile back into range; it is fully
        # masked inside the kernel so the duplicated data contributes nothing.
        return jnp.minimum(c * tiles_per_core + k, tiles_total - 1)

    const = lambda a: pl.BlockSpec(a.shape, lambda c, k: (0,) * a.ndim)  # resident
    wbf = lambda name: params[name].astype(jnp.bfloat16)
    bf32 = lambda name: params[name].astype(jnp.float32)

    kernel = functools.partial(_phi_scatter_kernel, n_nodes, tn, tiles_per_core, b_pad)

    grid_spec = pltpu.PrefetchScalarGridSpec(
        num_scalar_prefetch=0,
        grid=(_NUM_CORES, tiles_per_core),
        in_specs=[
            pl.BlockSpec((1, tn), lambda c, k: (0, stream_idx(c, k))),    # batch ids
            pl.BlockSpec((tn, f_x), lambda c, k: (stream_idx(c, k), 0)),  # node feats
            const(params["w1"]), const(params["b1"]),
            const(params["w2"]), const(params["b2"]),
        ],
        out_specs=pl.BlockSpec((None, b_pad, h), lambda c, k: (c, 0, 0)),
    )

    partial_agg = pl.pallas_call(
        kernel,
        out_shape=jax.ShapeDtypeStruct((_NUM_CORES, b_pad, h), jnp.float32),
        grid_spec=grid_spec,
        compiler_params=pltpu.CompilerParams(
            dimension_semantics=("parallel", "arbitrary"),  # cores || node reduction
            vmem_limit_bytes=32 * 1024 * 1024,              # safe on v5e/v6e/v7x
        ),
    )(batch2d, x, wbf("w1"), bf32("b1"), wbf("w2"), bf32("b2"))

    # Combine the per-core partial aggregates and apply the rho MLP.  This is a
    # [B, h] problem with tiny B, so plain XLA (f32) is cheaper than another kernel.
    agg = jnp.sum(partial_agg, axis=0)[:n_graphs]
    r1 = jnp.maximum(agg @ params["w3"] + params["b3"], 0.0)
    return r1 @ params["w4"] + params["b4"]


# ---------------- references ----------------

def deepset_reference_f32(x, batch, params, n_graphs):
    h1 = jnp.maximum(x @ params["w1"] + params["b1"], 0.0)
    phi = h1 @ params["w2"] + params["b2"]
    agg = jax.ops.segment_sum(phi, batch, num_segments=n_graphs)
    r1 = jnp.maximum(agg @ params["w3"] + params["b3"], 0.0)
    return r1 @ params["w4"] + params["b4"]


def deepset_reference_matching(x, batch, params, n_graphs):
    """Mirrors the kernel numerics: bf16 MXU operands / f32 accumulation for phi,
    phi rounded to bf16 before the scatter sum, rho in plain f32."""
    bf, f32 = jnp.bfloat16, jnp.float32
    mm = lambda a, w: jax.lax.dot(a.astype(bf), w.astype(bf),
                                  preferred_element_type=f32)
    h1 = jnp.maximum(mm(x, params["w1"]) + params["b1"], 0.0)
    phi = mm(h1, params["w2"]) + params["b2"]
    phi = phi.astype(bf).astype(f32)
    agg = jax.ops.segment_sum(phi, batch, num_segments=n_graphs)
    r1 = jnp.maximum(agg @ params["w3"] + params["b3"], 0.0)
    return r1 @ params["w4"] + params["b4"]


def init_params(key, f_x, h, f_out, mlp_hidden):
    keys = jax.random.split(key, 8)

    def lin(kw, kb, fin, fo):
        scale = 1.0 / jnp.sqrt(jnp.float32(fin))
        w = jax.random.uniform(kw, (fin, fo), jnp.float32, -scale, scale)
        b = jax.random.uniform(kb, (1, fo), jnp.float32, -scale, scale)
        return w, b

    w1, b1 = lin(keys[0], keys[1], f_x, mlp_hidden)
    w2, b2 = lin(keys[2], keys[3], mlp_hidden, h)
    w3, b3 = lin(keys[4], keys[5], h, mlp_hidden)
    w4, b4 = lin(keys[6], keys[7], mlp_hidden, f_out)
    return dict(w1=w1, b1=b1, w2=w2, b2=b2, w3=w3, b3=b3, w4=w4, b4=b4)


if __name__ == "__main__":
    # f_dict-implied dims (small synthetic sizes): f_x, h, f_out; mlp_layers=[32]
    f_x, h, f_out = 8, 32, 16
    mlp_hidden = 32
    n_graphs = 4

    key = jax.random.PRNGKey(0)
    kx, kb, kp = jax.random.split(key, 3)
    params = init_params(kp, f_x, h, f_out, mlp_hidden)

    def check(n_nodes, node_tile, kxi, kbi):
        x = jax.random.normal(kxi, (n_nodes, f_x), dtype=jnp.float32)
        batch = jax.random.randint(kbi, (n_nodes,), 0, n_graphs, jnp.int32)  # unsorted
        out = jax.block_until_ready(
            deepset_forward(x, batch, params, n_graphs, node_tile=node_tile))
        assert out.shape == (n_graphs, f_out)
        ref_m = deepset_reference_matching(x, batch, params, n_graphs)
        ref_f = deepset_reference_f32(x, batch, params, n_graphs)
        assert jnp.allclose(out, ref_m, atol=1e-3, rtol=1e-3)
        assert jnp.allclose(out, ref_f, atol=1e-1, rtol=1e-1)

    kx1, kx2, kx3 = jax.random.split(kx, 3)
    kb1, kb2, kb3 = jax.random.split(kb, 3)
    check(64, 4096, kx1, kb1)    # single tile, ragged tail + fully-masked core-1 tile
    check(256, 128, kx2, kb2)    # exact split: one full tile per core, no clamp
    check(300, 128, kx3, kb3)    # multi-tile per core + clamped overflow tile

    print("KERNEL_OK")
</pallas_src>

<mosaic_0001>
module attributes {stable_mosaic.version = 11 : i64} {
  func.func @_phi_scatter_kernel(%arg0: i32, %arg1: i32, %arg2: memref<1x128xi32, #tpu.memory_space<vmem>>, %arg3: memref<128x8xf32, #tpu.memory_space<vmem>>, %arg4: memref<8x32xbf16, #tpu.memory_space<vmem>>, %arg5: memref<1x32xf32, #tpu.memory_space<vmem>>, %arg6: memref<32x32xbf16, #tpu.memory_space<vmem>>, %arg7: memref<1x32xf32, #tpu.memory_space<vmem>>, %arg8: memref<1x8x32xf32, #tpu.memory_space<vmem>>) attributes {dimension_semantics = [#tpu.dimension_semantics<parallel>, #tpu.dimension_semantics<arbitrary>], iteration_bounds = array<i64: 2, 1>, scalar_prefetch = 0 : i64, scratch_operands = 0 : i64, tpu.core_type = #tpu.core_type<tc>, window_params = [{transform_indices = @transform_0, window_bounds = array<i64: 1, 128>}, {transform_indices = @transform_1, window_bounds = array<i64: 128, 8>}, {pipeline_mode = #tpu.pipeline_mode<synchronous>, transform_indices = @transform_2, window_bounds = array<i64: 8, 32>}, {pipeline_mode = #tpu.pipeline_mode<synchronous>, transform_indices = @transform_3, window_bounds = array<i64: 1, 32>}, {pipeline_mode = #tpu.pipeline_mode<synchronous>, transform_indices = @transform_4, window_bounds = array<i64: 32, 32>}, {pipeline_mode = #tpu.pipeline_mode<synchronous>, transform_indices = @transform_5, window_bounds = array<i64: 1, 32>}, {transform_indices = @transform_6, window_bounds = array<i64: 1, 8, 32>}]} {
    %c0_i32 = arith.constant 0 : i32
    %0 = arith.cmpi eq, %arg1, %c0_i32 : i32
    %1 = arith.extui %0 : i1 to i32
    %c0_i32_0 = arith.constant 0 : i32
    %2 = arith.cmpi ne, %1, %c0_i32_0 : i32
    scf.if %2 {
      %cst_23 = arith.constant 0.000000e+00 : f32
      %52 = vector.broadcast %cst_23 : f32 to vector<8x32xf32>
      %c0_24 = arith.constant 0 : index
      %c0_25 = arith.constant 0 : index
      %c0_26 = arith.constant 0 : index
      %53 = vector.load %arg8[%c0_24, %c0_25, %c0_26] : memref<1x8x32xf32, #tpu.memory_space<vmem>>, vector<1x8x32xf32>
      %54 = vector.shape_cast %53 : vector<1x8x32xf32> to vector<8x32xf32>
      %55 = vector.shape_cast %52 : vector<8x32xf32> to vector<1x8x32xf32>
      tpu.vector_store %arg8[%c0_24, %c0_25, %c0_26], %55 {strides = array<i32>} : memref<1x8x32xf32, #tpu.memory_space<vmem>>, vector<1x8x32xf32>,
    } else {
    }
    %c1_i32 = arith.constant 1 : i32
    %3 = arith.muli %arg0, %c1_i32 : i32
    %4 = arith.addi %3, %arg1 : i32
    %c128_i32 = arith.constant 128 : i32
    %5 = arith.muli %4, %c128_i32 : i32
    %6 = tpu.iota {dimensions = array<i32: 0>} : vector<128x1xi32>
    %7 = vector.broadcast %5 : i32 to vector<128x1xi32>
    %8 = arith.addi %7, %6 : vector<128x1xi32>
    %c64_i32 = arith.constant 64 : i32
    %9 = vector.broadcast %c64_i32 : i32 to vector<128x1xi32>
    %10 = arith.cmpi slt, %8, %9 : vector<128x1xi32>
    %c0 = arith.constant 0 : index
    %c0_1 = arith.constant 0 : index
    %11 = vector.load %arg3[%c0, %c0_1] : memref<128x8xf32, #tpu.memory_space<vmem>>, vector<128x8xf32>
    %cst = arith.constant 0.000000e+00 : f32
    %12 = vector.shape_cast %10 : vector<128x1xi1> to vector<128x1xi1>
    %13 = vector.broadcast %12 : vector<128x1xi1> to vector<128x8xi1>
    %14 = vector.broadcast %cst : f32 to vector<128x8xf32>
    %15 = arith.select %13, %11, %14 : vector<128x8xi1>, vector<128x8xf32>
    %16 = arith.truncf %15 : vector<128x8xf32> to vector<128x8xbf16>
    %c0_2 = arith.constant 0 : index
    %c0_3 = arith.constant 0 : index
    %17 = vector.load %arg4[%c0_2, %c0_3] : memref<8x32xbf16, #tpu.memory_space<vmem>>, vector<8x32xbf16>
    %cst_4 = arith.constant dense<0.000000e+00> : vector<128x32xf32>
    %18 = tpu.matmul %16, %17, %cst_4 {dimension_numbers = #tpu.dot_dimension_numbers<[1], [0], [0], [1], [0, 0, 1, 1], [], []>} : vector<128x8xbf16>, vector<8x32xbf16>, vector<128x32xf32> -> vector<128x32xf32>
    %c0_5 = arith.constant 0 : index
    %c0_6 = arith.constant 0 : index
    %19 = vector.load %arg5[%c0_5, %c0_6] : memref<1x32xf32, #tpu.memory_space<vmem>>, vector<1x32xf32>
    %20 = vector.broadcast %19 : vector<1x32xf32> to vector<128x32xf32>
    %21 = arith.addf %18, %20 : vector<128x32xf32>
    %cst_7 = arith.constant 0.000000e+00 : f32
    %22 = vector.broadcast %cst_7 : f32 to vector<128x32xf32>
    %23 = arith.maximumf %21, %22 : vector<128x32xf32>
    %24 = arith.truncf %23 : vector<128x32xf32> to vector<128x32xbf16>
    %c0_8 = arith.constant 0 : index
    %c0_9 = arith.constant 0 : index
    %25 = vector.load %arg6[%c0_8, %c0_9] : memref<32x32xbf16, #tpu.memory_space<vmem>>, vector<32x32xbf16>
    %cst_10 = arith.constant dense<0.000000e+00> : vector<128x32xf32>
    %26 = tpu.matmul %24, %25, %cst_10 {dimension_numbers = #tpu.dot_dimension_numbers<[1], [0], [0], [1], [0, 0, 1, 1], [], []>} : vector<128x32xbf16>, vector<32x32xbf16>, vector<128x32xf32> -> vector<128x32xf32>
    %c0_11 = arith.constant 0 : index
    %c0_12 = arith.constant 0 : index
    %27 = vector.load %arg7[%c0_11, %c0_12] : memref<1x32xf32, #tpu.memory_space<vmem>>, vector<1x32xf32>
    %28 = vector.broadcast %27 : vector<1x32xf32> to vector<128x32xf32>
    %29 = arith.addf %26, %28 : vector<128x32xf32>
    %30 = tpu.iota {dimensions = array<i32: 1>} : vector<1x128xi32>
    %31 = vector.broadcast %5 : i32 to vector<1x128xi32>
    %32 = arith.addi %31, %30 : vector<1x128xi32>
    %c64_i32_13 = arith.constant 64 : i32
    %33 = vector.broadcast %c64_i32_13 : i32 to vector<1x128xi32>
    %34 = arith.cmpi slt, %32, %33 : vector<1x128xi32>
    %c0_14 = arith.constant 0 : index
    %c0_15 = arith.constant 0 : index
    %35 = vector.load %arg2[%c0_14, %c0_15] : memref<1x128xi32, #tpu.memory_space<vmem>>, vector<1x128xi32>
    %c8_i32 = arith.constant 8 : i32
    %36 = vector.broadcast %c8_i32 : i32 to vector<1x128xi32>
    %37 = arith.select %34, %35, %36 : vector<1x128xi1>, vector<1x128xi32>
    %38 = tpu.iota {dimensions = array<i32: 0>} : vector<8x128xi32>
    %39 = vector.broadcast %37 : vector<1x128xi32> to vector<8x128xi32>
    %40 = arith.cmpi eq, %38, %39 : vector<8x128xi32>
    %41 = arith.extui %40 : vector<8x128xi1> to vector<8x128xi32>
    %42 = arith.sitofp %41 : vector<8x128xi32> to vector<8x128xf32>
    %43 = arith.truncf %42 : vector<8x128xf32> to vector<8x128xbf16>
    %c0_16 = arith.constant 0 : index
    %c0_17 = arith.constant 0 : index
    %c0_18 = arith.constant 0 : index
    %44 = vector.load %arg8[%c0_16, %c0_17, %c0_18] : memref<1x8x32xf32, #tpu.memory_space<vmem>>, vector<1x8x32xf32>
    %45 = vector.shape_cast %44 : vector<1x8x32xf32> to vector<8x32xf32>
    %46 = arith.truncf %29 : vector<128x32xf32> to vector<128x32xbf16>
    %cst_19 = arith.constant dense<0.000000e+00> : vector<8x32xf32>
    %47 = tpu.matmul %43, %46, %cst_19 {dimension_numbers = #tpu.dot_dimension_numbers<[1], [0], [0], [1], [0, 0, 1, 1], [], []>} : vector<8x128xbf16>, vector<128x32xbf16>, vector<8x32xf32> -> vector<8x32xf32>
    %48 = arith.addf %45, %47 : vector<8x32xf32>
    %c0_20 = arith.constant 0 : index
    %c0_21 = arith.constant 0 : index
    %c0_22 = arith.constant 0 : index
    %49 = vector.load %arg8[%c0_20, %c0_21, %c0_22] : memref<1x8x32xf32, #tpu.memory_space<vmem>>, vector<1x8x32xf32>
    %50 = vector.shape_cast %49 : vector<1x8x32xf32> to vector<8x32xf32>
    %51 = vector.shape_cast %48 : vector<8x32xf32> to vector<1x8x32xf32>
    tpu.vector_store %arg8[%c0_20, %c0_21, %c0_22], %51 {strides = array<i32>} : memref<1x8x32xf32, #tpu.memory_space<vmem>>, vector<1x8x32xf32>,
    return
  }
  func.func @transform_0(%arg0: i32, %arg1: i32) -> (i32, i32) {
    %c1_i32 = arith.constant 1 : i32
    %0 = arith.muli %arg0, %c1_i32 : i32
    %1 = arith.addi %0, %arg1 : i32
    %c0_i32 = arith.constant 0 : i32
    %2 = arith.minsi %1, %c0_i32 : i32
    %c0_i32_0 = arith.constant 0 : i32
    %c0_i32_1 = arith.constant 0 : i32
    return %c0_i32_0, %2 : i32, i32
  }
  func.func @transform_1(%arg0: i32, %arg1: i32) -> (i32, i32) {
    %c1_i32 = arith.constant 1 : i32
    %0 = arith.muli %arg0, %c1_i32 : i32
    %1 = arith.addi %0, %arg1 : i32
    %c0_i32 = arith.constant 0 : i32
    %2 = arith.minsi %1, %c0_i32 : i32
    %c0_i32_0 = arith.constant 0 : i32
    %c0_i32_1 = arith.constant 0 : i32
    return %2, %c0_i32_0 : i32, i32
  }
  func.func @transform_2(%arg0: i32, %arg1: i32) -> (i32, i32) {
    %c0_i32 = arith.constant 0 : i32
    %c0_i32_0 = arith.constant 0 : i32
    %c0_i32_1 = arith.constant 0 : i32
    return %c0_i32, %c0_i32_0 : i32, i32
  }
  func.func @transform_3(%arg0: i32, %arg1: i32) -> (i32, i32) {
    %c0_i32 = arith.constant 0 : i32
    %c0_i32_0 = arith.constant 0 : i32
    %c0_i32_1 = arith.constant 0 : i32
    return %c0_i32, %c0_i32_0 : i32, i32
  }
  func.func @transform_4(%arg0: i32, %arg1: i32) -> (i32, i32) {
    %c0_i32 = arith.constant 0 : i32
    %c0_i32_0 = arith.constant 0 : i32
    %c0_i32_1 = arith.constant 0 : i32
    return %c0_i32, %c0_i32_0 : i32, i32
  }
  func.func @transform_5(%arg0: i32, %arg1: i32) -> (i32, i32) {
    %c0_i32 = arith.constant 0 : i32
    %c0_i32_0 = arith.constant 0 : i32
    %c0_i32_1 = arith.constant 0 : i32
    return %c0_i32, %c0_i32_0 : i32, i32
  }
  func.func @transform_6(%arg0: i32, %arg1: i32) -> (i32, i32, i32) {
    %c0_i32 = arith.constant 0 : i32
    %c0_i32_0 = arith.constant 0 : i32
    %c0_i32_1 = arith.constant 0 : i32
    return %arg0, %c0_i32, %c0_i32_0 : i32, i32, i32
  }
}

</mosaic_0001>

<bundles_post_ra>
// kernel: tpu_custom_call.1
= control target key start
LH: loop header
LB: loop body
LE: loop exit
PB: predicated region body
PF: predicated region fallthrough
CT: control target
= control target key end

     0   :  { %11 = vsyncpa [#allocation3], 0  ;;  %s1223_s0 = inlined_call_operand.vmem [shape: s32[1,64], index: 0, kind: input, shape index: {}]   ;;  %s1224_s1 = inlined_call_operand.vmem [shape: f32[64,8], index: 1, kind: input, shape index: {}]   ;;  %s1225_s2 = inlined_call_operand.vmem [shape: bf16[8,32], index: 2, kind: input, shape index: {}]   ;;  %s1226_s3 = inlined_call_operand.vmem [shape: f32[1,32], index: 3, kind: input, shape index: {}]   ;;  %s1227_s4 = inlined_call_operand.vmem [shape: bf16[32,32], index: 4, kind: input, shape index: {}]   ;;  %s1228_s5 = inlined_call_operand.vmem [shape: f32[1,32], index: 5, kind: input, shape index: {}]   ;;  %s1229_s6 = inlined_call_operand.hbm [shape: f32[2,8,32], index: 6, kind: output, shape index: {}]  }
   0x1   :  { %13 = vsyncpa [#allocation3 + $0x1], 0  ;;  %s1013_s21 = smov 0   ;;  %s1015_s22 = smov 0  }
   0x2   :  { %s1017_s23 = smov 0   ;;  %s1019_s24 = smov 0  }
   0x3   :  { %s1021_s25 = smov 0   ;;  %s1023_s26 = smov 0  }
   0x4 LB: > { %s789_s27 = sadd.s32 4294967295, %s974_s26   ;;  %s790_s28 = sadd.s32 4294967294, %s974_s26   ;;  %s974_s26 = sphi %s1023_s26, %s19_s26   ;;  %s970_s25 = sphi %s1021_s25, %s1236_s25   ;;  %s966_s24 = sphi %s1019_s24, %s1235_s24   ;;  %s962_s23 = sphi %s1017_s23, %s1234_s23   ;;  %s958_s22 = sphi %s1015_s22, %s1233_s22   ;;  %s954_s21 = sphi %s1013_s21, %s1232_s21  }
   0x5   : > { %s31_s29 = sadd.s32 1, %s970_s25  ;;  %s186_s30 = sadd.s32 1, %s962_s23 }
   0x6   : > { %p33_p0 = scmp.ge.s32.totalorder %s31_s29, 2  ;;  %p196_p1 = scmp.ne.s32.totalorder %s962_s23, %s958_s22 }
   0x7   : > { %p197_p2 = scmp.eq.s32.totalorder %s789_s27, 1  ;;  %p202_p3 = scmp.ne.s32.totalorder %s958_s22, %s954_s21 }
   0x8   : > { %s1238_s29 = smov (%p33_p0, %s31_s29), 0  ;;  %p203_p5 = scmp.eq.s32.totalorder %s790_s28, 1 }
   0x9   : > { %p1053_p4 = por %p197_p2, %p196_p1  ;;  %s183_s8 = ssub.s32 %s970_s25, %s1238_s29 }
   0xa   : > { %p793_p6 = scmp.ge.s32.totalorder %s974_s26, 1  ;;  %p184_p7 = scmp.eq.s32.totalorder %s183_s8, 0 }
   0xb   : > { %p1060_p8 = por %p203_p5, %p202_p3  ;;  %p264_p9 = scmp.lt.s32.totalorder %s974_s26, 3 }
   0xc   : > { %s1066_s10 = scalar_select %p184_p7, %s962_s23, %s186_s30  }
   0xd   : > { %p265_p10 = pnand %p793_p6, %p264_p9 }
   0xe   : > { %p306_p11 = scmp.lt.s32.totalorder (!%p265_p10), %s966_s24, 0  ;;  %s800_s13 = sshll.u32 (!%p265_p10), %s966_s24, 7 }
   0xf   : > { %268 = sbr.rel (%p265_p10) target bundleno = 533 (0x215), region = 44 }
  0x14   : > { %v461_v0 = vld [vmem:[%s1225_s2] sm:$0xf]  ;;  %vm491_vm0 = vcmask 1043456   ;;  %v339_v1 = vlaneseq  ;;  %s1076_s14 = scalar_select %p306_p11, %s966_s24, 0  ;;  %v1081_v4 = vstv %s800_s13  ;;  %vm466_vm5 = vcmask 64512  }
  0x15   : > { %v493_v2 = vsel %vm491_vm0, %v461_v0, 0 }
  0x16   : > { %502 = vmatpush.bf16.msra.mxu0 %v493_v2  ;;  %834 = vmatpush.bf16.msra.mxu2 %v493_v2  ;;  %v1079_v3 = vshrl.u32 %v339_v1, 7  ;;  %s798_s15 = sshll.u32 %s1076_s14, 4  ;;  %s1242_s14 = smov (!%p306_p11, %s1076_s14), 0 }
  0x17   : > { %p320_p12 = scmp.lt.s32.totalorder %s798_s15, 7  ;;  %s310_s20 = scalar_lea.vmem %s1223_s0, %s1242_s14 }
  0x18   : > { %v341_v5 = vadd.s32 8, %v1079_v3  ;;  %v350_v6 = vadd.s32 80, %v1079_v3  ;;  %v351_v7 = vadd.s32 88, %v1079_v3  ;;  %v357_v8 = vadd.s32 %v1081_v4, %v1079_v3  ;;  %s829_s14 = sshll.u32 %s966_s24, 3 }
  0x19   : > { %s1240_s15 = smov (!%p320_p12, %s798_s15), 7  ;;  %v342_v21 = vadd.s32 16, %v1079_v3  ;;  %v343_v22 = vadd.s32 24, %v1079_v3  ;;  %v352_v24 = vadd.s32 96, %v1079_v3  ;;  %v353_v25 = vadd.s32 104, %v1079_v3  ;;  %s708_s30 = scalar_lea.hbm %s1229_s6, %s829_s14 }
  0x1a   : > { %v358_v9 = vadd.s32 %v1081_v4, %v341_v5  ;;  %v367_v10 = vadd.s32 %v1081_v4, %v350_v6  ;;  %v368_v11 = vadd.s32 %v1081_v4, %v351_v7  ;;  %s799_s16 = sshll.u32 %s1240_s15, 3  ;;  %vm373_vm1 = vcmp.lt.s32.totalorder %v357_v8, 64  ;;  %s302_s15 = sand.u32 1, %s958_s22  }
  0x1b   : > { %s1095_s19 = scalar_lea.vmem %s1224_s1, %s799_s16  ;;  %v359_v26 = vadd.s32 %v1081_v4, %v342_v21  ;;  %v360_v27 = vadd.s32 %v1081_v4, %v343_v22  ;;  %v369_v28 = vadd.s32 %v1081_v4, %v352_v24  ;;  %v370_v29 = vadd.s32 %v1081_v4, %v353_v25  ;;  %s794_s16 = sshll.u32 %s302_s15, 3 }
  0x1c   : > { %vm374_vm2 = vcmp.lt.s32.totalorder %v358_v9, 64  ;;  %vm383_vm3 = vcmp.lt.s32.totalorder %v367_v10, 64  ;;  %vm384_vm4 = vcmp.lt.s32.totalorder %v368_v11, 64  ;;  %v389_v12 = vld [vmem:[%s1095_s19] sm:$0xff]  ;;  %v390_v13 = vld [vmem:[%s1095_s19 + $0x8] sm:$0xff]  ;;  %v399_v14 = vld [vmem:[%s1095_s19 + $0x50] sm:$0xff] }
  0x1d   : > { %v437_v15 = vsel %vm373_vm1, %v389_v12, 0.0  ;;  %v438_v16 = vsel %vm374_vm2, %v390_v13, 0.0  ;;  %v400_v17 = vld [vmem:[%s1095_s19 + $0x58] sm:$0xff]  ;;  %v447_v18 = vsel %vm383_vm3, %v399_v14, 0.0  ;;  %vm375_vm6 = vcmp.lt.s32.totalorder %v359_v26, 64  ;;  %v391_v30 = vld [vmem:[%s1095_s19 + $0x10] sm:$0xff] }
  0x1e   : > { %v453_v19 = vpack.c.bf16 %v438_v16, %v437_v15  ;;  %v448_v20 = vsel %vm384_vm4, %v400_v17, 0.0  ;;  %vm376_vm7 = vcmp.lt.s32.totalorder %v360_v27, 64  ;;  %v392_v31 = vld [vmem:[%s1095_s19 + $0x18] sm:$0xff]  ;;  %vm385_vm8 = vcmp.lt.s32.totalorder %v369_v28, 64  ;;  %v401_v32 = vld [vmem:[%s1095_s19 + $0x60] sm:$0xff]  ;;  %v402_v33 = vld [vmem:[%s1095_s19 + $0x68] sm:$0xff] }
  0x1f   : > { %v458_v23 = vpack.c.bf16 %v448_v20, %v447_v18  ;;  %vm386_vm9 = vcmp.lt.s32.totalorder %v370_v29, 64  ;;  %v439_v34 = vsel %vm375_vm6, %v391_v30, 0.0  ;;  %v440_v35 = vsel %vm376_vm7, %v392_v31, 0.0  ;;  %v393_v48 = vld [vmem:[%s1095_s19 + $0x20] sm:$0xff]  ;;  %v394_v49 = vld [vmem:[%s1095_s19 + $0x28] sm:$0xff]  ;;  %v403_v50 = vld [vmem:[%s1095_s19 + $0x70] sm:$0xff] }
  0x20   : > { %801 = vmatmul.msk.bf16.vlgmr.msra.gmra.mxu0 %vm466_vm5, %v453_v19  ;;  %v449_v36 = vsel %vm385_vm8, %v401_v32, 0.0  ;;  %v450_v37 = vsel %vm386_vm9, %v402_v33, 0.0  ;;  %v454_v38 = vpack.c.bf16 %v440_v35, %v439_v34  ;;  %v344_v40 = vadd.s32 32, %v1079_v3  ;;  %v404_v51 = vld [vmem:[%s1095_s19 + $0x78] sm:$0xff]  ;;  %v395_v62 = vld [vmem:[%s1095_s19 + $0x30] sm:$0xff]  ;;  %v397_v10 = vld [vmem:[%s1095_s19 + $0x40] sm:$0xff] }
  0x21   : > { %806 = vmatmul.msk.bf16.vlgmr.msra.gmra.mxu2 %vm466_vm5, %v458_v23  ;;  %v459_v39 = vpack.c.bf16 %v450_v37, %v449_v36  ;;  %v345_v41 = vadd.s32 40, %v1079_v3  ;;  %v354_v42 = vadd.s32 112, %v1079_v3  ;;  %v355_v43 = vadd.s32 120, %v1079_v3  ;;  %v396_v63 = vld [vmem:[%s1095_s19 + $0x38] sm:$0xff]  ;;  %v398_v11 = vld [vmem:[%s1095_s19 + $0x48] sm:$0xff]  ;;  %v832_v16 = vld [vmem:[%s1227_s4] sm:$0xff] }
  0x22   : > { %v361_v44 = vadd.s32 %v1081_v4, %v344_v40  ;;  %v346_v58 = vadd.s32 48, %v1079_v3  ;;  %v347_v59 = vadd.s32 56, %v1079_v3  ;;  %v348_v6 = vadd.s32 64, %v1079_v3  ;;  %v833_v15 = vld [vmem:[%s1227_s4 + $0x8] sm:$0xff]  ;;  %v894_v18 = vld [vmem:[%s1226_s3] ss:$0 sm:$0xff] }
  0x23   : > { %v362_v45 = vadd.s32 %v1081_v4, %v345_v41  ;;  %v371_v46 = vadd.s32 %v1081_v4, %v354_v42  ;;  %v372_v47 = vadd.s32 %v1081_v4, %v355_v43  ;;  %v349_v7 = vadd.s32 72, %v1079_v3  ;;  %619 = vmatpush.bf16.msra.mxu1 %v833_v15  ;;  %835 = vmatpush.bf16.msra.mxu3 %v833_v15  ;;  %s1168_s17 = scalar_lea.vmem [#allocation2], %s794_s16  ;;  %s712_s11 = sshll.u32 %s708_s30, 4  ;;  %s713_s11 = int_to_ptr.hbm [resolvable:$true] %s712_s11 }
  0x24   : > { %vm377_vm10 = vcmp.lt.s32.totalorder %v361_v44, 64  ;;  %v363_v60 = vadd.s32 %v1081_v4, %v346_v58  ;;  %v364_v61 = vadd.s32 %v1081_v4, %v347_v59  ;;  %v365_v8 = vadd.s32 %v1081_v4, %v348_v6  ;;  %s710_s8 = sshll.u32 %s1168_s17, 4  ;;  %s698_s12 = scalar_lea.sflag [#allocation3], %s302_s15  ;;  %s711_s8 = int_to_ptr.vmem [resolvable:$true] %s710_s8 }
  0x25   : > { %vm378_vm11 = vcmp.lt.s32.totalorder %v362_v45, 64  ;;  %vm387_vm12 = vcmp.lt.s32.totalorder %v371_v46, 64  ;;  %vm388_vm13 = vcmp.lt.s32.totalorder %v372_v47, 64  ;;  %v441_v52 = vsel %vm377_vm10, %v393_v48, 0.0  ;;  %s910_s13 = sshra.s32 %s713_s11, 4  ;;  %s916_s19 = scalar_lea.hbm %s1229_s6, 16  ;;  %s911_s13 = int_to_ptr.hbm [resolvable:$true] %s910_s13 }
  0x26   : > { %v442_v53 = vsel %vm378_vm11, %v394_v49, 0.0  ;;  %v451_v54 = vsel %vm387_vm12, %v403_v50, 0.0  ;;  %v452_v55 = vsel %vm388_vm13, %v404_v51, 0.0  ;;  %vm379_vm14 = vcmp.lt.s32.totalorder %v363_v60, 64  ;;  %s912_s16 = scalar_lea.hbm %s911_s13, 8  ;;  %p917_p2 = scmp.lt.s32.totalorder %s911_s13, %s1229_s6 }
  0x27   : > { %v455_v56 = vpack.c.bf16 %v442_v53, %v441_v52  ;;  %v460_v57 = vpack.c.bf16 %v452_v55, %v451_v54  ;;  %vm380_vm15 = vcmp.lt.s32.totalorder %v364_v61, 64  ;;  %v443_v0 = vsel %vm379_vm14, %v395_v62, 0.0  ;;  %620 = vmatpush.bf16.msra.mxu1 %v832_v16  ;;  %836 = vmatpush.bf16.msra.mxu3 %v832_v16  ;;  %p913_p13 = scmp.ne.s32.totalorder %s911_s13, %s912_s16  ;;  %p918_p3 = scmp.lt.s32.totalorder %s916_s19, %s912_s16 }
  0x28   : > { %v444_v2 = vsel %vm380_vm15, %v396_v63, 0.0  ;;  %v366_v9 = vadd.s32 %v1081_v4, %v349_v7  ;;  %vm381_vm0 = vcmp.lt.s32.totalorder %v365_v8, 64  ;;  %vm335_vm2 = vcmask 261120  }
  0x29   : > { %v456_v5 = vpack.c.bf16 %v444_v2, %v443_v0  ;;  %v445_v12 = vsel %vm381_vm0, %v397_v10, 0.0  ;;  %p914_p0 = pnand %p913_p13, %p1053_p4  ;;  %p919_p5 = por %p918_p3, %p917_p2 }
  0x2a   : > { %vm382_vm1 = vcmp.lt.s32.totalorder %v366_v9, 64 }
  0x2b   : > { %v446_v13 = vsel %vm382_vm1, %v398_v11, 0.0  ;;  %p915_p1 = pneg %p914_p0 }
  0x2c   : > { %v457_v14 = vpack.c.bf16 %v446_v13, %v445_v12 }
  0x2d   : > { %p920_p6 = pnand %p919_p5, %p915_p1 }
  0x30   : > { %802 = vmatmul.msk.bf16.gmra.mxu0 %vm466_vm5, %v454_v38 }
  0x31   : > { %807 = vmatmul.msk.bf16.gmra.mxu2 %vm466_vm5, %v459_v39 }
  0x40   : > { %803 = vmatmul.msk.bf16.gmra.mxu0 %vm466_vm5, %v455_v56 }
  0x41   : > { %808 = vmatmul.msk.bf16.gmra.mxu2 %vm466_vm5, %v460_v57 }
  0x50   : > { %804 = vmatmul.msk.bf16.gmra.mxu0 %vm466_vm5, %v456_v5 }
  0x60   : > { %805 = vmatmul.msk.bf16.gmra.mxu0 %vm466_vm5, %v457_v14  ;;  %v895_v14 = vld [vmem:[%s1228_s5] ss:$0 sm:$0xff] }
  0x9d   : > { %v504_v17 = vpop.f32.mrf.mxu0 }
  0x9e   : > { %v505_v19 = vadd.f32 %v894_v18, %v504_v17 }
  0xa0   : > { %v544_v23 = vmax.f32 %v505_v19, 0.0 }
  0xa4   : > { %v529_v20 = vpop.f32.mrf.mxu2 }
  0xa5   : > { %v506_v21 = vpop.f32.mrf.mxu0  ;;  %v530_v25 = vadd.f32 %v894_v18, %v529_v20 }
  0xa6   : > { %v507_v22 = vadd.f32 %v894_v18, %v506_v21 }
  0xa7   : > { %v554_v28 = vmax.f32 %v530_v25, 0.0 }
  0xa8   : > { %v545_v24 = vmax.f32 %v507_v22, 0.0 }
  0xaa   : > { %v560_v26 = vpack.c.bf16 %v545_v24, %v544_v23 }
  0xac   : > { %v531_v27 = vpop.f32.mrf.mxu2  ;;  %817 = vmatmul.msk.bf16.vlgmr.msra.gmra.mxu1 %vm335_vm2, %v560_v26 }
  0xad   : > { %v532_v29 = vadd.f32 %v894_v18, %v531_v27  ;;  %v509_v30 = vpop.f32.mrf.mxu0 }
  0xae   : > { %v510_v33 = vadd.f32 %v894_v18, %v509_v30 }
  0xaf   : > { %v555_v31 = vmax.f32 %v532_v29, 0.0 }
  0xb0   : > { %v546_v37 = vmax.f32 %v510_v33, 0.0 }
  0xb1   : > { %v565_v32 = vpack.c.bf16 %v555_v31, %v554_v28 }
  0xb3   : > { %822 = vmatmul.msk.bf16.vlgmr.msra.gmra.mxu3 %vm335_vm2, %v565_v32 }
  0xb4   : > { %v534_v34 = vpop.f32.mrf.mxu2 }
  0xb5   : > { %v511_v35 = vpop.f32.mrf.mxu0  ;;  %v535_v39 = vadd.f32 %v894_v18, %v534_v34 }
  0xb6   : > { %v512_v36 = vadd.f32 %v894_v18, %v511_v35 }
  0xb7   : > { %v556_v42 = vmax.f32 %v535_v39, 0.0 }
  0xb8   : > { %v547_v38 = vmax.f32 %v512_v36, 0.0 }
  0xba   : > { %v561_v40 = vpack.c.bf16 %v547_v38, %v546_v37 }
  0xbc   : > { %v536_v41 = vpop.f32.mrf.mxu2  ;;  %818 = vmatmul.msk.bf16.gmra.mxu1 %vm335_vm2, %v561_v40 }
  0xbd   : > { %v537_v43 = vadd.f32 %v894_v18, %v536_v41  ;;  %v514_v44 = vpop.f32.mrf.mxu0  ;;  %v976_v41 = vmov 0.0  }
  0xbe   : > { %v515_v47 = vadd.f32 %v894_v18, %v514_v44  ;;  %336 = vst.msk [vmem:[%s1168_s17] sm:$0xff] %vm335_vm2, %v976_v41 }
  0xbf   : > { %v557_v45 = vmax.f32 %v537_v43, 0.0  ;;  %v663_v43 = vand.u32 127, %v339_v1 }
  0xc0   : > { %v548_v51 = vmax.f32 %v515_v47, 0.0 }
  0xc1   : > { %v566_v46 = vpack.c.bf16 %v557_v45, %v556_v42 }
  0xc3   : > { %823 = vmatmul.msk.bf16.gmra.mxu3 %vm335_vm2, %v566_v46 }
  0xc4   : > { %v539_v48 = vpop.f32.mrf.mxu2 }
  0xc5   : > { %v516_v49 = vpop.f32.mrf.mxu0  ;;  %v540_v53 = vadd.f32 %v894_v18, %v539_v48  ;;  %v664_v48 = vadd.s32 %v663_v43, %v1081_v4 }
  0xc6   : > { %v517_v50 = vadd.f32 %v894_v18, %v516_v49 }
  0xc7   : > { %v558_v56 = vmax.f32 %v540_v53, 0.0  ;;  %vm665_vm3 = vcmp.lt.s32.totalorder %v664_v48, 64 }
  0xc8   : > { %v549_v52 = vmax.f32 %v517_v50, 0.0 }
  0xca   : > { %v562_v54 = vpack.c.bf16 %v549_v52, %v548_v51  ;;  %v666_v52 = vld [vmem:[%s310_s20] sm:$0x1] }
  0xcc   : > { %v541_v55 = vpop.f32.mrf.mxu2  ;;  %819 = vmatmul.msk.bf16.gmra.mxu1 %vm335_vm2, %v562_v54 }
  0xcd   : > { %v542_v57 = vadd.f32 %v894_v18, %v541_v55  ;;  %v519_v58 = vpop.f32.mrf.mxu0  ;;  %v667_v55 = vsel %vm665_vm3, %v666_v52, 8 }
  0xce   : > { %v520_v61 = vadd.f32 %v894_v18, %v519_v58  ;;  %v668_v4 = vperm.slane %v667_v55, 0  ;;  %v977_v58 = vmov 1.0|1.0  }
  0xcf   : > { %v559_v59 = vmax.f32 %v542_v57, 0.0 }
  0xd0   : > { %v550_v0 = vmax.f32 %v520_v61, 0.0  ;;  %vm669_vm4 = vcmp.eq.s32.totalorder %v1079_v3, %v668_v4 }
  0xd1   : > { %v567_v60 = vpack.c.bf16 %v559_v59, %v558_v56  ;;  %vm826_vm5 = vmpackc.low %vm669_vm4, %vm669_vm4  ;;  %v673_v59 = vld [vmem:[%s1168_s17] sm:$0xff] }
  0xd3   : > { %824 = vmatmul.msk.bf16.gmra.mxu3 %vm335_vm2, %v567_v60 }
  0xd5   : > { %v521_v62 = vpop.f32.mrf.mxu0 }
  0xd6   : > { %v522_v63 = vadd.f32 %v894_v18, %v521_v62 }
  0xd8   : > { %v551_v2 = vmax.f32 %v522_v63, 0.0 }
  0xda   : > { %v563_v5 = vpack.c.bf16 %v551_v2, %v550_v0 }
  0xdc   : > { %820 = vmatmul.msk.bf16.gmra.mxu1 %vm335_vm2, %v563_v5 }
  0xdd   : > { %v524_v6 = vpop.f32.mrf.mxu0 }
  0xde   : > { %v525_v7 = vadd.f32 %v894_v18, %v524_v6 }
  0xe0   : > { %v552_v10 = vmax.f32 %v525_v7, 0.0 }
  0xe5   : > { %v526_v8 = vpop.f32.mrf.mxu0 }
  0xe6   : > { %v527_v9 = vadd.f32 %v894_v18, %v526_v8 }
  0xe8   : > { %v553_v11 = vmax.f32 %v527_v9, 0.0 }
  0xea   : > { %v564_v12 = vpack.c.bf16 %v553_v11, %v552_v10 }
  0xec   : > { %821 = vmatmul.msk.bf16.gmra.mxu1 %vm335_vm2, %v564_v12 }
 0x129   : > { %v622_v13 = vpop.f32.mrf.mxu1 }
 0x12a   : > { %v623_v16 = vadd.f32 %v895_v14, %v622_v13 }
 0x131   : > { %v624_v15 = vpop.f32.mrf.mxu1 }
 0x132   : > { %v625_v17 = vadd.f32 %v895_v14, %v624_v15 }
 0x134   : > { %v674_v19 = vpack.c.bf16 %v625_v17, %v623_v16 }
 0x136   : > { %v647_v20 = vpop.f32.mrf.mxu3 }
 0x137   : > { %v648_v38 = vadd.f32 %v895_v14, %v647_v20 }
 0x139   : > { %v627_v21 = vpop.f32.mrf.mxu1 }
 0x13a   : > { %v628_v56 = vadd.f32 %v895_v14, %v627_v21 }
 0x13e   : > { %v649_v22 = vpop.f32.mrf.mxu3 }
 0x13f   : > { %v650_v36 = vadd.f32 %v895_v14, %v649_v22 }
 0x141   : > { %v629_v23 = vpop.f32.mrf.mxu1  ;;  %v679_v40 = vpack.c.bf16 %v650_v36, %v648_v38 }
 0x142   : > { %v630_v53 = vadd.f32 %v895_v14, %v629_v23 }
 0x144   : > { %v675_v57 = vpack.c.bf16 %v630_v53, %v628_v56 }
 0x146   : > { %v652_v18 = vpop.f32.mrf.mxu3 }
 0x147   : > { %v653_v35 = vadd.f32 %v895_v14, %v652_v18 }
 0x149   : > { %v632_v24 = vpop.f32.mrf.mxu1 }
 0x14a   : > { %v633_v1 = vadd.f32 %v895_v14, %v632_v24 }
 0x14e   : > { %v654_v25 = vpop.f32.mrf.mxu3 }
 0x14f   : > { %v655_v32 = vadd.f32 %v895_v14, %v654_v25 }
 0x151   : > { %v634_v26 = vpop.f32.mrf.mxu1  ;;  %v680_v37 = vpack.c.bf16 %v655_v32, %v653_v35 }
 0x152   : > { %v635_v50 = vadd.f32 %v895_v14, %v634_v26 }
 0x154   : > { %v676_v54 = vpack.c.bf16 %v635_v50, %v633_v1 }
 0x156   : > { %v657_v27 = vpop.f32.mrf.mxu3 }
 0x157   : > { %v658_v30 = vadd.f32 %v895_v14, %v657_v27 }
 0x159   : > { %v637_v28 = vpop.f32.mrf.mxu1 }
 0x15a   : > { %v638_v49 = vadd.f32 %v895_v14, %v637_v28 }
 0x15e   : > { %v659_v29 = vpop.f32.mrf.mxu3 }
 0x15f   : > { %v660_v31 = vadd.f32 %v895_v14, %v659_v29 }
 0x161   : > { %v639_v33 = vpop.f32.mrf.mxu1  ;;  %v681_v34 = vpack.c.bf16 %v660_v31, %v658_v30 }
 0x162   : > { %v640_v46 = vadd.f32 %v895_v14, %v639_v33 }
 0x163   : > { %682 = vmatpush.bf16.msrb.mxu2 %v681_v34 }
 0x164   : > { %v677_v51 = vpack.c.bf16 %v640_v46, %v638_v49 }
 0x167   : > { %683 = vmatpush.bf16.msrb.mxu2 %v680_v37 }
 0x169   : > { %v642_v39 = vpop.f32.mrf.mxu1 }
 0x16a   : > { %v643_v44 = vadd.f32 %v895_v14, %v642_v39 }
 0x16b   : > { %684 = vmatpush.bf16.msrb.mxu2 %v679_v40 }
 0x171   : > { %v644_v42 = vpop.f32.mrf.mxu1 }
 0x172   : > { %v645_v45 = vadd.f32 %v895_v14, %v644_v42 }
 0x174   : > { %v678_v47 = vpack.c.bf16 %v645_v45, %v643_v44 }
 0x176   : > { %685 = vmatpush.bf16.msrb.mxu2 %v678_v47 }
 0x17a   : > { %686 = vmatpush.bf16.msrb.mxu2 %v677_v51 }
 0x17e   : > { %687 = vmatpush.bf16.msrb.mxu2 %v676_v54 }
 0x182   : > { %688 = vmatpush.bf16.msrb.mxu2 %v675_v57 }
 0x186   : > { %689 = vmatpush.bf16.msrb.mxu2 %v674_v19 }
 0x189   : > { %827 = vmatmul.msk.bf16.vlgmr.msrb.gmra.mxu2 %vm826_vm5, %v977_v58 }
 0x20c   : > { %v691_v60 = vpop.f32.mrf.mxu2 }
 0x20d   : > { %v695_v61 = vadd.f32 %v691_v60, %v673_v59 }
 0x20f   : > { %696 = vst.msk [vmem:[%s1168_s17] sm:$0xff] %vm335_vm2, %v695_v61 }
 0x210   : > { %923 = shalt.err (!%p920_p6)
}
 0x211   : > { %837 = dma.vmem_to_hbm [thread:$0]  (%p1053_p4), %s711_s8, 128, %s713_s11, %s698_s12  }
 0x214   : > { %v693_v3 = vpop.f32.mrf.mxu2 }
 0x215 PF: > { %p843_p7 = scmp.ge.s32.totalorder %s974_s26, 2  ;;  %s724_s15 = sand.u32 1, %s954_s21  }
 0x216   : > { %s725_s17 = scalar_lea.sflag [#allocation3], %s724_s15 }
 0x217   : > { %p840_p9 = pnand %p843_p7, %p1060_p8 }
 0x219   : > { %p841_p10 = pneg %p840_p9 }
 0x21b   : > { %949 = dma.done.wait (%p841_p10), %s725_s17, 128  }
 0x21c   : > { %951 = vsyncadd (%p841_p10), %s725_s17, 4294967168  ;;  %s19_s26 = sadd.s32 1, %s974_s26   ;;  %s1232_s21 = smov %s958_s22 }
 0x21d   : > { %p16_p11 = scmp.ge.s32.totalorder %s19_s26, 4   ;;  %s1233_s22 = smov %s962_s23 }
 0x21e   : > { %s1234_s23 = smov %s1066_s10  ;;  %s1235_s24 = smov %s970_s25 }
 0x21f   : > { %s1236_s25 = smov %s1238_s29  ;;  %18 = sbr.rel (!%p16_p11) target bundleno = 4 (0x4), region = 86 }
 0x224   :  { %731 = vsyncpa [#allocation3], 1 }
 0x225   :  { %733 = vsyncpa [#allocation3 + $0x1], 1 }

</bundles_post_ra>
